<compile_context>
chip_gen: v6e
topology: v6e:2x2x1
jax: 0.10.0
libtpu: 0.0.40
codegen_flags: <defaults>
</compile_context>

<pallas_src>
import jax
import jax.numpy as jnp
from jax.experimental import pallas as pl
from jax.experimental.pallas import tpu as pltpu


def _affine_kernel(alpha_ref, beta_ref, x_ref, o_ref):
    # alpha_ref / beta_ref: (1,) f32 scalars in SMEM
    # x_ref / o_ref:        (tile_rows, width) tile in VMEM
    a = alpha_ref[0]
    b = beta_ref[0]
    o_ref[...] = (a * x_ref[...] + b).astype(o_ref.dtype)


def _sublane_multiple(dtype):
    # native sublane packing: 8 rows for 32-bit, 16 for 16-bit, 32 for 8-bit
    return {4: 8, 2: 16, 1: 32}.get(jnp.dtype(dtype).itemsize, 8)


def lambda_layer(x, alpha, beta):
    """LambdaLayer instantiated with lambd(x) = alpha * x + beta (elementwise)."""
    orig_shape = x.shape
    dtype = x.dtype
    total = x.size
    itemsize = jnp.dtype(dtype).itemsize
    sublane = _sublane_multiple(dtype)

    # ---- lane-dense 2-D slab (rows, width); avoid padding whenever possible ----
    width = None
    for w in (1024, 512, 256, 128):
        if total % w == 0:
            width = w
            break
    if width is None:
        # Rare fallback (element count not a multiple of 128): minimal pad.
        width = 128
        padded_total = pl.cdiv(total, width) * width
    else:
        padded_total = total

    x_flat = x.reshape(-1)
    if padded_total != total:
        x_flat = jnp.pad(x_flat, (0, padded_total - total))
    rows = padded_total // width
    x2d = x_flat.reshape(rows, width)

    # ---- row tile: ~2 MiB per buffer.  Double-buffered in + out = ~8 MiB,
    # comfortably under scoped-VMEM defaults on v5e (16 MiB), v6e (32 MiB) and
    # v7x (32 MiB scoped / 64 MiB physical), while still saturating HBM. ----
    target_bytes = 2 * 1024 * 1024
    tile_rows = max(sublane, (target_bytes // (width * itemsize)) // sublane * sublane)

    if rows <= tile_rows:
        # Small input: one block equal to the full array shape (always legal).
        block_shape = (rows, width)
        grid = (1,)
    else:
        block_shape = (tile_rows, width)
        grid = (pl.cdiv(rows, tile_rows),)  # partial last block handled by Pallas

    alpha = jnp.asarray(alpha, dtype=jnp.float32).reshape((1,))
    beta = jnp.asarray(beta, dtype=jnp.float32).reshape((1,))

    out2d = pl.pallas_call(
        _affine_kernel,
        out_shape=jax.ShapeDtypeStruct((rows, width), dtype),
        grid=grid,
        in_specs=[
            pl.BlockSpec(memory_space=pltpu.SMEM),        # alpha (1,)
            pl.BlockSpec(memory_space=pltpu.SMEM),        # beta  (1,)
            pl.BlockSpec(block_shape, lambda i: (i, 0)),  # x tile
        ],
        out_specs=pl.BlockSpec(block_shape, lambda i: (i, 0)),
        compiler_params=pltpu.CompilerParams(
            dimension_semantics=("parallel",),            # shard blocks across TCs (v7x)
        ),
    )(alpha, beta, x2d)

    out_flat = out2d.reshape(-1)
    if padded_total != total:
        out_flat = out_flat[:total]
    return out_flat.reshape(orig_shape)


# TODO(synk): a fully generic LambdaLayer (arbitrary Python `lambd`, e.g. the
# strided-slice + channel-pad shortcut) has no single Pallas equivalent; only
# the elementwise affine instance is implemented here.


if __name__ == "__main__":
    key = jax.random.PRNGKey(0)
    # NCHW input, small shape
    x = jax.random.normal(key, (2, 4, 16, 16), dtype=jnp.float32)

    # (alpha, beta) pairs: the torch-style ones/zeros default and a nontrivial pair.
    for a_val, b_val in ((1.0, 0.0), (0.75, -1.25)):
        alpha = jnp.full((1,), a_val, dtype=jnp.float32)
        beta = jnp.full((1,), b_val, dtype=jnp.float32)

        out = lambda_layer(x, alpha, beta)
        out = jax.block_until_ready(out)

        ref = alpha[0] * x + beta[0]
        assert out.shape == x.shape and out.dtype == x.dtype
        assert jnp.allclose(out, ref, atol=1e-6), "mismatch vs reference"

    print("KERNEL_OK")
</pallas_src>

<mosaic_0001>
module attributes {stable_mosaic.version = 11 : i64} {
  func.func @_affine_kernel(%arg0: i32, %arg1: memref<1xf32, #tpu.memory_space<smem>>, %arg2: memref<1xf32, #tpu.memory_space<smem>>, %arg3: memref<2x1024xf32, #tpu.memory_space<vmem>>, %arg4: memref<2x1024xf32, #tpu.memory_space<vmem>>) attributes {dimension_semantics = [#tpu.dimension_semantics<parallel>], iteration_bounds = array<i64: 1>, scalar_prefetch = 0 : i64, scratch_operands = 0 : i64, tpu.core_type = #tpu.core_type<tc>, window_params = [{transform_indices = @transform_0, window_bounds = array<i64: 1>}, {transform_indices = @transform_1, window_bounds = array<i64: 1>}, {transform_indices = @transform_2, window_bounds = array<i64: 2, 1024>}, {transform_indices = @transform_3, window_bounds = array<i64: 2, 1024>}]} {
    %c0 = arith.constant 0 : index
    %0 = memref.load %arg1[%c0] : memref<1xf32, #tpu.memory_space<smem>>
    %c0_0 = arith.constant 0 : index
    %1 = memref.load %arg2[%c0_0] : memref<1xf32, #tpu.memory_space<smem>>
    %c0_1 = arith.constant 0 : index
    %c0_2 = arith.constant 0 : index
    %2 = vector.load %arg3[%c0_1, %c0_2] : memref<2x1024xf32, #tpu.memory_space<vmem>>, vector<2x1024xf32>
    %3 = vector.broadcast %0 : f32 to vector<2x1024xf32>
    %4 = arith.mulf %3, %2 : vector<2x1024xf32>
    %5 = vector.broadcast %1 : f32 to vector<2x1024xf32>
    %6 = arith.addf %4, %5 : vector<2x1024xf32>
    %c0_3 = arith.constant 0 : index
    %c0_4 = arith.constant 0 : index
    %7 = vector.load %arg4[%c0_3, %c0_4] : memref<2x1024xf32, #tpu.memory_space<vmem>>, vector<2x1024xf32>
    tpu.vector_store %arg4[%c0_3, %c0_4], %6 {strides = array<i32>} : memref<2x1024xf32, #tpu.memory_space<vmem>>, vector<2x1024xf32>,
    return
  }
  func.func @transform_0(%arg0: i32) -> i32 {
    %c0_i32 = arith.constant 0 : i32
    %c0_i32_0 = arith.constant 0 : i32
    return %c0_i32 : i32
  }
  func.func @transform_1(%arg0: i32) -> i32 {
    %c0_i32 = arith.constant 0 : i32
    %c0_i32_0 = arith.constant 0 : i32
    return %c0_i32 : i32
  }
  func.func @transform_2(%arg0: i32) -> (i32, i32) {
    %c0_i32 = arith.constant 0 : i32
    %c0_i32_0 = arith.constant 0 : i32
    return %arg0, %c0_i32 : i32, i32
  }
  func.func @transform_3(%arg0: i32) -> (i32, i32) {
    %c0_i32 = arith.constant 0 : i32
    %c0_i32_0 = arith.constant 0 : i32
    return %arg0, %c0_i32 : i32, i32
  }
}

</mosaic_0001>

<bundles_post_ra>
// kernel: tpu_custom_call.1
= control target key start
LH: loop header
LB: loop body
LE: loop exit
PB: predicated region body
PF: predicated region fallthrough
CT: control target
= control target key end

     0   :  { %10 = vsyncpa [#allocation5], 0  ;;  %s136_s0 = inlined_call_operand.<no memory space> [shape: f32[1], index: 0, kind: input, shape index: {}]   ;;  %s137_s1 = inlined_call_operand.<no memory space> [shape: f32[1], index: 1, kind: input, shape index: {}]   ;;  %s138_s2 = inlined_call_operand.hbm [shape: f32[2,1024], index: 2, kind: input, shape index: {}]   ;;  %s139_s3 = inlined_call_operand.hbm [shape: f32[2,1024], index: 3, kind: output, shape index: {}]  }
   0x1   :  { %11 = vsyncpa [#allocation6], 0  ;;  %s102_s12 = smov [#allocation4]  }
   0x2   :  { %s22_s13 = sshll.u32 %s102_s12, 4  ;;  %s23_s13 = int_to_ptr.vmem [resolvable:$true] %s22_s13 }
   0x3   :  { %s66_s14 = scalar_lea.vmem %s23_s13, 256  ;;  %p71_p1 = scmp.lt.s32.totalorder %s23_s13, %s23_s13 }
   0x4   :  { %p67_p0 = scmp.ne.s32.totalorder %s23_s13, %s66_s14  ;;  %p72_p2 = scmp.lt.s32.totalorder %s66_s14, %s66_s14 }
   0x6   :  { %p73_p3 = por %p72_p2, %p71_p1 }
   0x8   :  { %p74_p4 = pnand %p73_p3, %p67_p0 }
   0xa   :  { %77 = shalt.err (!%p74_p4)
}
   0xb   :  { %25 = dma.hbm_to_vmem [thread:$0]  %s138_s2, 256, %s23_s13, [#allocation5]  }
   0xc   :  { %98 = dma.done.wait [#allocation5], 256  }
   0xd   :  { %99 = vsyncadd [#allocation5], 4294967040  ;;  %v33_v0 = vstv %s136_s0  ;;  %v31_v1 = vld [vmem:[#allocation4] sm:$0xff]  ;;  %v36_v2 = vstv %s137_s1  ;;  %v32_v3 = vld [vmem:[#allocation4 + $0x8] sm:$0xff]  ;;  %s103_s21 = smov [#allocation7]  }
   0xe   :  { %s47_s22 = sshll.u32 %s103_s21, 4  ;;  %v34_v4 = vmul.f32 %v33_v0, %v31_v1  ;;  %v35_v5 = vmul.f32 %v33_v0, %v32_v3  ;;  %s48_s22 = int_to_ptr.vmem [resolvable:$true] %s47_s22 }
   0xf   :  { %s78_s2 = scalar_lea.vmem %s48_s22, 256  ;;  %p83_p6 = scmp.lt.s32.totalorder %s48_s22, %s48_s22 }
  0x10   :  { %v37_v6 = vadd.f32 %v36_v2, %v34_v4  ;;  %v38_v7 = vadd.f32 %v36_v2, %v35_v5  ;;  %p79_p5 = scmp.ne.s32.totalorder %s48_s22, %s78_s2  ;;  %p84_p7 = scmp.lt.s32.totalorder %s78_s2, %s78_s2 }
  0x12   :  { %39 = vst [vmem:[#allocation7] sm:$0xff] %v37_v6  ;;  %40 = vst [vmem:[#allocation7 + $0x8] sm:$0xff] %v38_v7  ;;  %p85_p8 = por %p84_p7, %p83_p6 }
  0x14   :  { %p86_p9 = pnand %p85_p8, %p79_p5 }
  0x16   :  { %89 = shalt.err (!%p86_p9)
}
  0x17   :  { %50 = dma.vmem_to_hbm [thread:$0]  %s48_s22, 256, %s139_s3, [#allocation6]  }
  0x18   :  { %100 = dma.done.wait [#allocation6], 256  }
  0x19   :  { %101 = vsyncadd [#allocation6], 4294967040 }
  0x1a   :  { %54 = vsyncpa [#allocation5], 1 }
  0x1b   :  { %55 = vsyncpa [#allocation6], 1 }

</bundles_post_ra>
